<compile_context>
chip_gen: v7x
topology: tpu7x:2x2x1
jax: 0.10.0
libtpu: 0.0.40
codegen_flags: <defaults>
</compile_context>

<pallas_src>
import math

import jax
import jax.numpy as jnp
from jax.experimental import pallas as pl
from jax.experimental.pallas import tpu as pltpu


def _round_up(n, m):
    return ((n + m - 1) // m) * m


def _pick_tile(n, candidates):
    """Largest candidate that divides n exactly, else n (full dim is always legal)."""
    for t in candidates:
        if n % t == 0:
            return t
    return n


def _token_embed_kernel(x_ref, w_ref, o_ref):
    # x_ref: (TL, 3*C_in)   im2col tile (batch dim squeezed away)
    # w_ref: (3*C_in, TE)   folded conv weight tile (lane-dense, resident)
    # o_ref: (TL, TE)
    o_ref[...] = jnp.dot(
        x_ref[...], w_ref[...], preferred_element_type=jnp.float32
    ).astype(o_ref.dtype)


def prepare_weight(weight_eck):
    """PyTorch Conv1d weight (E, C_in, 3) -> lane-dense (3*C_in, E_pad) operand.

    Call once per parameter (off the per-forward hot path).
    """
    E, c_in, K = weight_eck.shape
    assert K == 3
    w = jnp.transpose(weight_eck, (2, 1, 0)).reshape(K * c_in, E)  # row = k*C_in + c
    e_pad = _round_up(E, 128)
    if e_pad != E:
        w = jnp.pad(w, ((0, 0), (0, e_pad - E)))
    return w


def token_embedding(x, w_prepared, out_features, *, dot_dtype=None):
    """x: (B, L, C_in) float32; w_prepared: (3*C_in, E_pad) from prepare_weight.

    Returns (B, L, out_features) float32, matching
    tokenConv(x.permute(0,2,1)).transpose(1,2) of the PyTorch module.
    """
    B, L, c_in = x.shape
    K3, E_pad = w_prepared.shape
    assert K3 == 3 * c_in
    assert out_features <= E_pad

    # Fused circular im2col: channel-concat of the three shifted taps.
    # tap k contributes x[b, (l + k - 1) mod L, c]  (circular padding of 1).
    x_col = jnp.concatenate(
        [jnp.roll(x, 1, axis=1), x, jnp.roll(x, -1, axis=1)], axis=-1
    )  # (B, L, 3*C_in)

    if dot_dtype is not None:
        x_col = x_col.astype(dot_dtype)
        w_prepared = w_prepared.astype(dot_dtype)

    # Tile sizes: bounded VMEM (v7x-safe), lane-dense output (TE % 128 == 0).
    TL = _pick_tile(L, (1024, 512, 256, 128, 64, 32, 16, 8))
    TE = _pick_tile(E_pad, (2048, 1024, 512, 256, 128))
    grid = (B, L // TL, E_pad // TE)

    out = pl.pallas_call(
        _token_embed_kernel,
        out_shape=jax.ShapeDtypeStruct((B, L, E_pad), jnp.float32),
        grid_spec=pltpu.PrefetchScalarGridSpec(
            num_scalar_prefetch=0,
            grid=grid,
            in_specs=[
                # batch dim squeezed; x block constant over the E axis -> resident
                pl.BlockSpec((None, TL, K3), lambda b, l, e: (b, l, 0)),
                # weight constant over B and L -> resident across those axes
                pl.BlockSpec((K3, TE), lambda b, l, e: (0, e)),
            ],
            out_specs=pl.BlockSpec((None, TL, TE), lambda b, l, e: (b, l, e)),
        ),
        compiler_params=pltpu.CompilerParams(
            dimension_semantics=("parallel", "parallel", "parallel"),
        ),
    )(x_col, w_prepared)

    if out_features != E_pad:
        out = out[:, :, :out_features]
    return out


def make_weight(key, c_in, embedding_size):
    """Deterministic Kaiming-normal (fan_in, leaky_relu) init, PyTorch Conv1d shape."""
    kernel_size = 3
    fan_in = c_in * kernel_size
    negative_slope = 0.01  # PyTorch default for nonlinearity='leaky_relu'
    gain = math.sqrt(2.0 / (1.0 + negative_slope ** 2))
    std = gain / math.sqrt(fan_in)
    return std * jax.random.normal(
        key, (embedding_size, c_in, kernel_size), dtype=jnp.float32
    )


def reference(x, weight):
    """Pure-JAX reference of the PyTorch forward (sanity check)."""
    x_pad = jnp.concatenate([x[:, -1:, :], x, x[:, :1, :]], axis=1)
    w_kce = jnp.transpose(weight, (2, 1, 0))
    L = x.shape[1]
    out = jnp.zeros((x.shape[0], L, weight.shape[0]), jnp.float32)
    for k in range(3):
        out = out + jnp.einsum("blc,ce->ble", x_pad[:, k:k + L, :], w_kce[k])
    return out


if __name__ == "__main__":
    # Small shapes consistent with the module: batch=2, seq=8, c_in=4, E=32.
    B, L, C_in, E = 2, 8, 4, 32

    key = jax.random.PRNGKey(0)
    kx, kw = jax.random.split(key)
    x = jax.random.normal(kx, (B, L, C_in), dtype=jnp.float32)
    w = make_weight(kw, C_in, E)

    w_prep = prepare_weight(w)  # done once, off the per-call hot path
    out = jax.block_until_ready(token_embedding(x, w_prep, E))
    ref = reference(x, w)
    assert out.shape == (B, L, E)
    assert jnp.allclose(out, ref, atol=1e-4, rtol=1e-4)

    # bf16 MXU operand path (v5e/v6e/v7x), fp32 accumulation -> looser tolerance.
    out_bf16 = jax.block_until_ready(
        token_embedding(x, w_prep, E, dot_dtype=jnp.bfloat16)
    )
    assert jnp.allclose(out_bf16, ref, atol=5e-2, rtol=5e-2)

    # Exercise the tiled / E-padded path with a slightly larger, odd-ish shape.
    B2, L2, C2, E2 = 2, 256, 7, 96
    kx2, kw2 = jax.random.split(jax.random.PRNGKey(1))
    x2 = jax.random.normal(kx2, (B2, L2, C2), dtype=jnp.float32)
    w2 = make_weight(kw2, C2, E2)
    out2 = jax.block_until_ready(token_embedding(x2, prepare_weight(w2), E2))
    assert out2.shape == (B2, L2, E2)
    assert jnp.allclose(out2, reference(x2, w2), atol=1e-4, rtol=1e-4)

    print("KERNEL_OK")
</pallas_src>

<mosaic_0001>
module attributes {stable_mosaic.version = 11 : i64} {
  func.func @_token_embed_kernel(%arg0: i32, %arg1: i32, %arg2: i32, %arg3: memref<1x8x12xf32, #tpu.memory_space<vmem>>, %arg4: memref<12x128xf32, #tpu.memory_space<vmem>>, %arg5: memref<1x8x128xf32, #tpu.memory_space<vmem>>) attributes {dimension_semantics = [#tpu.dimension_semantics<parallel>, #tpu.dimension_semantics<parallel>, #tpu.dimension_semantics<parallel>], iteration_bounds = array<i64: 2, 1, 1>, scalar_prefetch = 0 : i64, scratch_operands = 0 : i64, tpu.core_type = #tpu.core_type<tc>, window_params = [{transform_indices = @transform_0, window_bounds = array<i64: 1, 8, 12>}, {transform_indices = @transform_1, window_bounds = array<i64: 12, 128>}, {transform_indices = @transform_2, window_bounds = array<i64: 1, 8, 128>}]} {
    %c0 = arith.constant 0 : index
    %c0_0 = arith.constant 0 : index
    %c0_1 = arith.constant 0 : index
    %0 = vector.load %arg3[%c0, %c0_0, %c0_1] : memref<1x8x12xf32, #tpu.memory_space<vmem>>, vector<1x8x12xf32>
    %1 = vector.shape_cast %0 : vector<1x8x12xf32> to vector<8x12xf32>
    %c0_2 = arith.constant 0 : index
    %c0_3 = arith.constant 0 : index
    %2 = vector.load %arg4[%c0_2, %c0_3] : memref<12x128xf32, #tpu.memory_space<vmem>>, vector<12x128xf32>
    %cst = arith.constant dense<0.000000e+00> : vector<8x128xf32>
    %3 = tpu.matmul %1, %2, %cst {dimension_numbers = #tpu.dot_dimension_numbers<[1], [0], [0], [1], [0, 0, 1, 1], [], []>} : vector<8x12xf32>, vector<12x128xf32>, vector<8x128xf32> -> vector<8x128xf32>
    %c0_4 = arith.constant 0 : index
    %c0_5 = arith.constant 0 : index
    %c0_6 = arith.constant 0 : index
    %4 = vector.load %arg5[%c0_4, %c0_5, %c0_6] : memref<1x8x128xf32, #tpu.memory_space<vmem>>, vector<1x8x128xf32>
    %5 = vector.shape_cast %4 : vector<1x8x128xf32> to vector<8x128xf32>
    %6 = vector.shape_cast %3 : vector<8x128xf32> to vector<1x8x128xf32>
    tpu.vector_store %arg5[%c0_4, %c0_5, %c0_6], %6 {strides = array<i32>} : memref<1x8x128xf32, #tpu.memory_space<vmem>>, vector<1x8x128xf32>,
    return
  }
  func.func @transform_0(%arg0: i32, %arg1: i32, %arg2: i32) -> (i32, i32, i32) {
    %c0_i32 = arith.constant 0 : i32
    %c0_i32_0 = arith.constant 0 : i32
    return %arg0, %arg1, %c0_i32 : i32, i32, i32
  }
  func.func @transform_1(%arg0: i32, %arg1: i32, %arg2: i32) -> (i32, i32) {
    %c0_i32 = arith.constant 0 : i32
    %c0_i32_0 = arith.constant 0 : i32
    return %c0_i32, %arg2 : i32, i32
  }
  func.func @transform_2(%arg0: i32, %arg1: i32, %arg2: i32) -> (i32, i32, i32) {
    %c0_i32 = arith.constant 0 : i32
    return %arg0, %arg1, %arg2 : i32, i32, i32
  }
}

</mosaic_0001>

<bundles_post_ra>
// kernel: tpu_custom_call.1
= control target key start
LH: loop header
LB: loop body
LE: loop exit
PB: predicated region body
PF: predicated region fallthrough
CT: control target
= control target key end

     0   :  { %7 = vsyncpa [#allocation3], 0  ;;  %s895_s0 = inlined_call_operand.hbm [shape: f32[2,8,12], index: 0, kind: input, shape index: {}]   ;;  %s896_s1 = inlined_call_operand.hbm [shape: f32[12,128], index: 1, kind: input, shape index: {}]   ;;  %s897_s2 = inlined_call_operand.hbm [shape: f32[2,8,128], index: 2, kind: output, shape index: {}]  }
   0x1   :  { %9 = vsyncpa [#allocation3 + $0x1], 0 }
   0x2   :  { %10 = vsyncpa [#allocation6], 0 }
   0x3   :  { %11 = vsyncpa [#allocation4], 0 }
   0x4   :  { %13 = vsyncpa [#allocation4 + $0x1], 0  ;;  %s681_s9 = smov 0   ;;  %s683_s10 = smov 0  }
   0x5   :  { %s685_s11 = smov 0   ;;  %s687_s12 = smov 0  }
   0x6   :  { %s689_s13 = smov 0   ;;  %s691_s14 = smov 0  }
   0x7 LB: > { %s401_s15 = sadd.s32 4294967295, %s655_s14   ;;  %s402_s16 = sadd.s32 4294967294, %s655_s14   ;;  %s655_s14 = sphi %s691_s14, %s19_s14   ;;  %s651_s13 = sphi %s689_s13, %s921_s13   ;;  %s647_s12 = sphi %s687_s12, %s920_s12   ;;  %s643_s11 = sphi %s685_s11, %s919_s11   ;;  %s639_s10 = sphi %s683_s10, %s918_s10   ;;  %s635_s9 = sphi %s681_s9, %s917_s9  }
   0x8   : > { %p60_p0 = scmp.ne.s32.totalorder %s639_s10, %s635_s9  ;;  %p715_p1 = scmp.eq.s32.totalorder %s401_s15, 0 }
   0x9   : > { %p719_p2 = scmp.eq.s32.totalorder %s401_s15, 1  ;;  %p120_p3 = scmp.eq.s32.totalorder %s402_s16, 1 }
   0xa   : > { %s902_s17 = scalar_select %p715_p1, 1, 0 }
   0xb   : > { %s903_s18 = scalar_select %p719_p2, 1, 0 }
   0xc   : > { %p725_p4 = por %p715_p1, %p60_p0  ;;  %p403_p5 = scmp.ge.s32.totalorder %s655_s14, 1 }
   0xd   : > { %p730_p6 = por %p120_p3, %p60_p0  ;;  %p127_p7 = scmp.lt.s32.totalorder %s655_s14, 3 }
   0xe   : > { %s904_s19 = scalar_select %p725_p4, 1, 0 }
   0xf   : > { %s905_s20 = scalar_select %p730_p6, 1, 0 }
  0x10   : > { %p735_p8 = pnand %p403_p5, %p127_p7  ;;  %s657_s22 = smov [#allocation5]  }
  0x11   : > { %s141_s23 = sshll.u32 %s657_s22, 4  ;;  %s38_s25 = sadd.s32 1, %s651_s13  ;;  %s142_s23 = int_to_ptr.vmem [resolvable:$true] %s141_s23 }
  0x12   : > { %s906_s21 = scalar_select %p735_p8, 1, 0 }
  0x13   : > { %p440_p9 = pneg %p735_p8  ;;  %s511_s28 = scalar_lea.hbm %s896_s1, 256 }
  0x14   : > { %p512_p12 = scmp.ne.s32.totalorder %s896_s1, %s511_s28  ;;  %p518_p5 = scmp.lt.u32.totalorder %s511_s28, %s896_s1 }
  0x15   : > { %p744_p11 = pnand %p440_p9, %p715_p1 }
  0x17   : > { %p513_p13 = pneg %p744_p11 }
  0x19   : > { %p514_p0 = pnand %p513_p13, %p512_p12 }
  0x1b   : > { %p515_p3 = pneg %p514_p0 }
  0x1d   : > { %p520_p7 = pnand %p518_p5, %p515_p3 }
  0x1f   : > { %523 = shalt.err (!%p520_p7)
}
  0x20   : > { %s524_s5 = scalar_lea.vmem %s142_s23, 256  ;;  %p532_p1 = scmp.lt.s32.totalorder %s142_s23, %s142_s23 }
  0x21   : > { %p525_p9 = scmp.ne.s32.totalorder %s142_s23, %s524_s5  ;;  %p533_p4 = scmp.lt.s32.totalorder %s524_s5, %s524_s5 }
  0x23   : > { %p527_p10 = pnand %p525_p9, %p513_p13  ;;  %p534_p8 = por %p533_p4, %p532_p1 }
  0x25   : > { %p528_p6 = pneg %p527_p10 }
  0x27   : > { %p535_p2 = pnand %p534_p8, %p528_p6 }
  0x29   : > { %538 = shalt.err (!%p535_p2)
}
  0x2a   : > { %s658_s6 = smov 128   ;;  %s659_s7 = smov 8  }
  0x2b   : > { %443 = dma.hbm_to_vmem [thread:$0]  (!%p744_p11), %s896_s1, 256, %s142_s23, [#allocation6], %s658_s6, %s658_s6, %s659_s7  }
  0x2c   : > { %p40_p1 = scmp.ge.s32.totalorder %s38_s25, 2  ;;  %s47_s16 = sadd.s32 1, %s643_s11 }
  0x2d   : > { %p54_p2 = scmp.ne.s32.totalorder %s643_s11, %s639_s10  ;;  %p55_p4 = scmp.eq.s32.totalorder %s655_s14, 0 }
  0x2e   : > { %s923_s25 = smov (%p40_p1, %s38_s25), 0  ;;  %p909_p8 = scmp.ne.s32.totalorder %s903_s18, 0 }
  0x2f   : > { %p771_p6 = por %p55_p4, %p54_p2  ;;  %s42_s24 = ssub.s32 %s651_s13, %s923_s25 }
  0x30   : > { %p777_p10 = por %p909_p8, %p54_p2  ;;  %p453_p12 = scmp.lt.s32.totalorder %s655_s14, 2 }
  0x31   : > { %p45_p11 = scmp.eq.s32.totalorder %s42_s24, 0  ;;  %s155_s23 = sand.u32 1, %s643_s11  }
  0x32   : > { %s406_s27 = sshll.u32 %s155_s23, 3  ;;  %s407_s29 = sshll.u32 %s651_s13, 7 }
  0x33   : > { %s786_s28 = scalar_select %p45_p11, %s643_s11, %s47_s16  }
  0x34   : > { %s792_s4 = scalar_lea.hbm %s895_s0, %s407_s29  ;;  %s159_s18 = scalar_lea.vmem [#allocation2], %s406_s27 }
  0x35   : > { %s167_s5 = sshll.u32 %s159_s18, 4  ;;  %p798_p13 = pnand %p453_p12, %p771_p6  ;;  %s794_s5 = int_to_ptr.vmem [resolvable:$true] %s167_s5 }
  0x36   : > { %s156_s7 = scalar_lea.sflag [#allocation3], %s155_s23  ;;  %s539_s8 = scalar_lea.hbm %s792_s4, 128 }
  0x37   : > { %p540_p0 = scmp.ne.s32.totalorder %s792_s4, %s539_s8  ;;  %p541_p3 = pneg %p798_p13 }
  0x38   : > { %s544_s24 = scalar_lea.hbm %s895_s0, 256  ;;  %p545_p9 = scmp.lt.u32.totalorder %s792_s4, %s895_s0 }
  0x39   : > { %p542_p5 = pnand %p541_p3, %p540_p0  ;;  %p546_p1 = scmp.lt.u32.totalorder %s544_s24, %s539_s8 }
  0x3a   : > { %p548_p4 = scmp.lt.u32.totalorder %s539_s8, %s792_s4 }
  0x3b   : > { %p543_p7 = pneg %p542_p5  ;;  %p547_p2 = por %p546_p1, %p545_p9 }
  0x3d   : > { %p549_p6 = por %p548_p4, %p547_p2 }
  0x3f   : > { %p550_p8 = pnand %p549_p6, %p543_p7 }
  0x41   : > { %553 = shalt.err (!%p550_p8)
}
  0x42   : > { %s554_s23 = scalar_lea.vmem %s794_s5, 128  ;;  %s660_s29 = smov [#allocation2]  }
  0x43   : > { %p555_p12 = scmp.ne.s32.totalorder %s794_s5, %s554_s23  ;;  %s559_s30 = sshll.u32 %s660_s29, 4  ;;  %s560_s30 = int_to_ptr.vmem [resolvable:$false] %s559_s30 }
  0x44   : > { %s561_s3 = scalar_lea.vmem %s560_s30, 256  ;;  %p562_p5 = scmp.lt.s32.totalorder %s794_s5, %s560_s30 }
  0x45   : > { %p557_p11 = pnand %p555_p12, %p541_p3  ;;  %p563_p9 = scmp.lt.s32.totalorder %s561_s3, %s554_s23 }
  0x47   : > { %p558_p0 = pneg %p557_p11  ;;  %p564_p1 = por %p563_p9, %p562_p5 }
  0x49   : > { %p565_p2 = pnand %p564_p1, %p558_p0 }
  0x4b   : > { %568 = shalt.err (!%p565_p2)
}
  0x4c   : > { %447 = dma.hbm_to_vmem [thread:$0]  (!%p798_p13), %s792_s4, 128, %s794_s5, %s156_s7  }
  0x4d   : > { %p912_p7 = scmp.ne.s32.totalorder %s906_s21, 0 }
  0x4e   : > { %s830_s18 = sand.u32 (!%p912_p7), 1, %s639_s10   ;;  %p913_p3 = scmp.ne.s32.totalorder (!%p912_p7), %s904_s19, 0 }
  0x4f   : > { %176 = sbr.rel (%p912_p7) target bundleno = 323 (0x143), region = 28  ;;  %s409_s8 = sshll.u32 (!%p912_p7), %s830_s18, 3 }
  0x50   : > { %s179_s15 = scalar_lea.sflag (!%p912_p7), [#allocation3], %s830_s18  ;;  %s182_s16 = scalar_lea.vmem (!%p912_p7), [#allocation2], %s409_s8 }
  0x56   : > { %622 = dma.done.wait (%p913_p3), %s179_s15, 128  }
  0x57   : > { %624 = vsyncadd (%p913_p3), %s179_s15, 4294967168  ;;  %p914_p4 = scmp.ne.s32.totalorder %s902_s17, 0 }
  0x59   : > { %626 = dma.done.wait (%p914_p4), [#allocation6], 256  }
  0x5a   : > { %628 = vsyncadd (%p914_p4), [#allocation6], 4294967040  ;;  %v661_v0 = vmov 0.0|0.0   ;;  %vm662_vm0 = vmmov 0   ;;  %v663_v1 = vmov 0.0   ;;  %vm214_vm1 = vcmask 1043456  }
  0x5b   : > { %428 = vmatprep.subr.bf16.mxu0 %v661_v0  ;;  %425 = vmatprep.mubr.msk.f32.mxu0 %vm662_vm0, %v663_v1  ;;  %v208_v2 = vld [vmem:[#allocation5] sm:$0xff]  ;;  %v209_v3 = vld [vmem:[#allocation5 + $0x8] sm:$0xf]  ;;  %vm664_vm2 = vmmov 1   ;;  %v207_v5 = vld [vmem:[%s182_s16] sm:$0xff]  ;;  %vm210_vm4 = vcmask 97280  }
  0x5c   : > { %vm430_vm3 = vmpackc.low %vm214_vm1, %vm664_vm2  ;;  %v429_v4 = vpack.c.bf16 %v209_v3, %v208_v2  ;;  %s206_s17 = scalar_lea.vmem [#allocation7], %s409_s8  ;;  %s415_s21 = sshll.u32 %s647_s12, 7 }
  0x5d   : > { %s305_s19 = sshll.u32 %s206_s17, 4  ;;  %s848_s6 = scalar_lea.hbm %s897_s2, %s415_s21  ;;  %s843_s19 = int_to_ptr.vmem [resolvable:$true] %s305_s19 }
  0x5e   : > { %431 = vmatpush3.bf16.msk.msra.mxu0 %vm430_vm3, %v429_v4  ;;  %s290_s7 = scalar_lea.sflag [#allocation4], %s830_s18  ;;  %s569_s24 = scalar_lea.vmem %s843_s19, 128 }
  0x5f   : > { %p570_p13 = scmp.ne.s32.totalorder %s843_s19, %s569_s24  ;;  %s665_s12 = smov [#allocation7]  }
  0x60   : > { %s573_s22 = sshll.u32 %s665_s12, 4  ;;  %s574_s22 = int_to_ptr.vmem [resolvable:$false] %s573_s22 }
  0x61   : > { %426 = vmatmul.mubr.msk.f32.vlgmr.msra.gmra.mrb[0].mxu0 %vm210_vm4, %v207_v5  ;;  %p571_p6 = pnand %p570_p13, %p777_p10  ;;  %s575_s27 = scalar_lea.vmem %s574_s22, 256 }
  0x62   : > { %p576_p12 = scmp.lt.s32.totalorder %s843_s19, %s574_s22  ;;  %p577_p11 = scmp.lt.s32.totalorder %s575_s27, %s569_s24 }
  0x63   : > { %p572_p8 = pneg %p571_p6 }
  0x64   : > { %p578_p0 = por %p577_p11, %p576_p12 }
  0x66   : > { %p579_p5 = pnand %p578_p0, %p572_p8 }
 0x134   : > { %v284_v6 = vpop.f32.mrb[0].mxu0 }
 0x135   : > { %288 = vst [vmem:[%s206_s17] sm:$0xff] %v284_v6  ;;  %v427_v7 = vpop.f32.mrb[1].mxu0 }
 0x136   : > { %582 = shalt.err (!%p579_p5)
}
 0x137   : > { %s583_s23 = scalar_lea.hbm %s848_s6, 128  ;;  %s587_s3 = scalar_lea.hbm %s897_s2, 256 }
 0x138   : > { %p584_p9 = scmp.ne.s32.totalorder %s848_s6, %s583_s23  ;;  %p588_p7 = scmp.lt.u32.totalorder %s848_s6, %s897_s2 }
 0x139   : > { %p589_p3 = scmp.lt.u32.totalorder %s587_s3, %s583_s23  ;;  %p591_p13 = scmp.lt.u32.totalorder %s583_s23, %s848_s6 }
 0x13a   : > { %p585_p1 = pnand %p584_p9, %p777_p10 }
 0x13b   : > { %p590_p4 = por %p589_p3, %p588_p7 }
 0x13c   : > { %p586_p2 = pneg %p585_p1 }
 0x13d   : > { %p592_p6 = por %p591_p13, %p590_p4 }
 0x13f   : > { %p593_p8 = pnand %p592_p6, %p586_p2 }
 0x141   : > { %596 = shalt.err (!%p593_p8)
}
 0x142   : > { %438 = dma.vmem_to_hbm [thread:$0]  (%p777_p10), %s843_s19, 128, %s848_s6, %s290_s7  }
 0x143 PF: > { %s317_s15 = sand.u32 1, %s635_s9   ;;  %p915_p12 = scmp.ne.s32.totalorder %s905_s20, 0 }
 0x144   : > { %p916_p11 = scmp.ge.s32.totalorder %s655_s14, 2  ;;  %s318_s16 = scalar_lea.sflag [#allocation4], %s317_s15 }
 0x146   : > { %p449_p0 = pnand %p916_p11, %p915_p12 }
 0x148   : > { %630 = dma.done.wait (!%p449_p0), %s318_s16, 128  }
 0x149   : > { %632 = vsyncadd (!%p449_p0), %s318_s16, 4294967168  ;;  %s19_s14 = sadd.s32 1, %s655_s14   ;;  %s917_s9 = smov %s639_s10 }
 0x14a   : > { %p16_p5 = scmp.ge.s32.totalorder %s19_s14, 4   ;;  %s918_s10 = smov %s643_s11 }
 0x14b   : > { %s919_s11 = smov %s786_s28  ;;  %s920_s12 = smov %s651_s13 }
 0x14c   : > { %s921_s13 = smov %s923_s25  ;;  %18 = sbr.rel (!%p16_p5) target bundleno = 7 (0x7), region = 78 }
 0x153   :  { %323 = vsyncpa [#allocation3], 1 }
 0x154   :  { %325 = vsyncpa [#allocation3 + $0x1], 1 }
 0x155   :  { %326 = vsyncpa [#allocation6], 1 }
 0x156   :  { %327 = vsyncpa [#allocation4], 1 }
 0x157   :  { %329 = vsyncpa [#allocation4 + $0x1], 1 }

</bundles_post_ra>
